<compile_context>
chip_gen: v5e
topology: v5e:2x2
jax: 0.10.0
libtpu: 0.0.40
codegen_flags: <defaults>
</compile_context>

<pallas_src>
import functools

import jax
import jax.numpy as jnp
from jax import lax
from jax.experimental import pallas as pl
from jax.experimental.pallas import tpu as pltpu

SMOOTH = 1e-05
LANE = 128
SUB = 8                      # f32 sublanes per vreg
MAX_ROW_TILE = 2048          # 2048 x 128 x 4 B = 1 MiB per f32 input block
OVERHEAD_ROWS = 256          # per-grid-step pipeline overhead, in row units

LN2 = 0.6931471805599453
# log(cosh(u)) = C2*u^2 + C4*u^4 + C6*u^6 + C8*u^8 + O(u^10); |u| <= 0.5.
C2 = 0.5
C4 = -1.0 / 12.0
C6 = 1.0 / 45.0
C8 = -17.0 / 2520.0


def _pad_bce_value():
    # bce for a padded element: logits=0 -> z=0.5, labels=0.
    # Same formula the kernel uses, evaluated on Python floats.
    z = 0.5
    w = 0.25 * z * z
    lcosh = w * (C2 + w * (C4 + w * (C6 + w * C8)))
    return z * 0.5 + LN2 + lcosh      # == 0.5 + log1p(exp(-0.5)) ~= 0.9740770


_PAD_BCE = _pad_bce_value()
_PAD_DENOM = 0.5                      # sigmoid(0) + 0


def _dice_bce_kernel(logits_ref, labels_ref,
                     inter_ref, denom_ref, bce_ref,
                     acc_i, acc_d, acc_b,
                     *, r_tile, unroll):
    s = pl.program_id(1)
    ns = pl.num_programs(1)

    @pl.when(s == 0)
    def _():
        acc_i[...] = jnp.zeros_like(acc_i)
        acc_d[...] = jnp.zeros_like(acc_d)
        acc_b[...] = jnp.zeros_like(acc_b)

    def chunk(i, carry):
        ai, ad, ab = carry
        o = pl.multiple_of(i * SUB, SUB)
        x = logits_ref[0, pl.ds(o, SUB), :].astype(jnp.float32)   # (8, 128)
        y = labels_ref[0, pl.ds(o, SUB), :].astype(jnp.float32)   # (8, 128)

        # probs = sigmoid(x) — single EUP op via tanh identity.
        z = 0.5 * jnp.tanh(0.5 * x) + 0.5

        # BCEWithLogits applied to z (the module's double-sigmoid quirk):
        #   z*(1-y) + log1p(exp(-z))
        # = z*(0.5-y) + log2 + logcosh(z/2)     (exact identity)
        # logcosh evaluated as an even polynomial on the VALU (no EUP).
        w = 0.25 * (z * z)
        lcosh = w * (C2 + w * (C4 + w * (C6 + w * C8)))
        bce = z * (0.5 - y) + (LN2 + lcosh)

        # Pure vreg-resident accumulation (no accumulator VMEM traffic).
        return ai + z * y, ad + (z + y), ab + bce

    zero = jnp.zeros((SUB, LANE), jnp.float32)
    ai, ad, ab = lax.fori_loop(0, r_tile // SUB, chunk, (zero, zero, zero),
                               unroll=unroll)

    acc_i[...] += ai
    acc_d[...] += ad
    acc_b[...] += ab

    @pl.when(s == ns - 1)
    def _():
        # One tiny (8-sublane) reduce per batch row; lane/batch combine
        # happens in the JAX wrapper.
        inter_ref[0] = jnp.sum(acc_i[...], axis=0, keepdims=True)
        denom_ref[0] = jnp.sum(acc_d[...], axis=0, keepdims=True)
        bce_ref[0] = jnp.sum(acc_b[...], axis=0, keepdims=True)


def _choose_tiling(r8, n_split):
    """Row tile (multiple of 8, <= MAX_ROW_TILE) minimizing pad + step cost."""
    best_t, best_cost = SUB, None
    for t in range(SUB, MAX_ROW_TILE + 1, SUB):
        steps = -(-r8 // (n_split * t))
        r_pad = n_split * t * steps
        cost = r_pad + OVERHEAD_ROWS * n_split * steps
        if best_cost is None or cost < best_cost or (cost == best_cost):
            best_t, best_cost = t, cost
    steps = -(-r8 // (n_split * best_t))
    return best_t, n_split * best_t * steps, steps


def dice_bce_loss(logits, labels):
    """logits, labels: (B, 1, H, W), any float/int dtype. Returns scalar f32 loss.

    Callers should keep logits in bf16 and labels in bf16/uint8 where possible;
    the kernel casts to f32 in VMEM, so narrow inputs halve HBM traffic.
    """
    B = logits.shape[0]
    n = logits.shape[-2] * logits.shape[-1]

    # squeeze(1) + flatten spatial dims; dtype cast happens inside the kernel.
    x = logits.reshape(B, n)
    y = labels.reshape(B, n)

    r = -(-n // LANE)                  # rows of 128 lanes
    r8 = -(-r // SUB) * SUB            # round rows up to a sublane multiple

    # Split odd/small batches spatially so both v7x TensorCores get work
    # (free on single-TC v5e/v6e — just one more grid boundary).
    n_split = 2 if (B % 2 == 1 and r8 >= 2 * SUB) else 1

    r_tile, r_pad, s_tiles = _choose_tiling(r8, n_split)
    n_pad = r_pad * LANE
    pad = n_pad - n                    # pad elements per original batch
    if pad:
        x = jnp.pad(x, ((0, 0), (0, pad)))
        y = jnp.pad(y, ((0, 0), (0, pad)))

    bs = B * n_split
    x = x.reshape(bs, r_pad // n_split, LANE)
    y = y.reshape(bs, r_pad // n_split, LANE)

    kernel = functools.partial(
        _dice_bce_kernel, r_tile=r_tile,
        unroll=min(8, max(1, r_tile // SUB)))

    out_struct = jax.ShapeDtypeStruct((bs, 1, LANE), jnp.float32)
    inter, denom, bce = pl.pallas_call(
        kernel,
        out_shape=(out_struct, out_struct, out_struct),
        grid_spec=pltpu.PrefetchScalarGridSpec(
            num_scalar_prefetch=0,
            grid=(bs, s_tiles),
            in_specs=[
                pl.BlockSpec((1, r_tile, LANE), lambda b, s: (b, s, 0)),
                pl.BlockSpec((1, r_tile, LANE), lambda b, s: (b, s, 0)),
            ],
            out_specs=[
                pl.BlockSpec((1, 1, LANE), lambda b, s: (b, 0, 0)),
                pl.BlockSpec((1, 1, LANE), lambda b, s: (b, 0, 0)),
                pl.BlockSpec((1, 1, LANE), lambda b, s: (b, 0, 0)),
            ],
            scratch_shapes=[pltpu.VMEM((SUB, LANE), jnp.float32)] * 3,
        ),
        compiler_params=pltpu.CompilerParams(
            dimension_semantics=("parallel", "arbitrary"),
        ),
    )(x, y)

    # Tiny final combine on (bs, 128) partials. Padded elements (logits=0,
    # labels=0) contributed exact constants; subtract them analytically.
    inter_b = jnp.sum(inter.reshape(B, -1), axis=1)                     # (B,)
    denom_b = jnp.sum(denom.reshape(B, -1), axis=1) - jnp.float32(_PAD_DENOM * pad)
    bce_sum = jnp.sum(bce) - jnp.float32(_PAD_BCE * pad * B)
    bce_loss = bce_sum / jnp.float32(B * n)                             # mean over TRUE count
    dice = 1.0 - (2.0 * inter_b + SMOOTH) / (denom_b + SMOOTH)
    return bce_loss + jnp.mean(dice)


def _reference(logits, labels):
    """Pure-JAX reference mirroring the PyTorch forward exactly."""
    logits = jnp.squeeze(logits, axis=1).astype(jnp.float32)
    labels = jnp.squeeze(labels, axis=1).astype(jnp.float32)
    probs = jax.nn.sigmoid(logits)
    z = probs
    bce = jnp.mean(jnp.maximum(z, 0.0) - z * labels + jnp.log1p(jnp.exp(-jnp.abs(z))))
    inter = jnp.sum(probs * labels, axis=(1, 2))
    denom = jnp.sum(probs, axis=(1, 2)) + jnp.sum(labels, axis=(1, 2))
    dice = jnp.mean(1.0 - (2.0 * inter + SMOOTH) / (denom + SMOOTH))
    return bce + dice


if __name__ == "__main__":
    key = jax.random.PRNGKey(0)
    k1, k2 = jax.random.split(key)
    B, C, H, W = 2, 1, 16, 16
    logits = jax.random.normal(k1, (B, C, H, W), dtype=jnp.float32)
    labels = (jax.random.uniform(k2, (B, C, H, W)) > 0.5).astype(jnp.float32)

    loss = jax.block_until_ready(jax.jit(dice_bce_loss)(logits, labels))
    ref = jax.block_until_ready(_reference(logits, labels))

    assert jnp.allclose(loss, ref, rtol=1e-5, atol=1e-5), (loss, ref)
    print("KERNEL_OK")
</pallas_src>

<mosaic_0001>
module attributes {stable_mosaic.version = 11 : i64} {
  func.func @_dice_bce_kernel(%arg0: i32, %arg1: i32, %arg2: memref<1x8x128xf32, #tpu.memory_space<vmem>>, %arg3: memref<1x8x128xf32, #tpu.memory_space<vmem>>, %arg4: memref<1x1x128xf32, #tpu.memory_space<vmem>>, %arg5: memref<1x1x128xf32, #tpu.memory_space<vmem>>, %arg6: memref<1x1x128xf32, #tpu.memory_space<vmem>>, %arg7: memref<8x128xf32, #tpu.memory_space<vmem>>, %arg8: memref<8x128xf32, #tpu.memory_space<vmem>>, %arg9: memref<8x128xf32, #tpu.memory_space<vmem>>) attributes {dimension_semantics = [#tpu.dimension_semantics<parallel>, #tpu.dimension_semantics<arbitrary>], iteration_bounds = array<i64: 2, 1>, scalar_prefetch = 0 : i64, scratch_operands = 3 : i64, tpu.core_type = #tpu.core_type<tc>, window_params = [{transform_indices = @transform_0, window_bounds = array<i64: 1, 8, 128>}, {transform_indices = @transform_1, window_bounds = array<i64: 1, 8, 128>}, {transform_indices = @transform_2, window_bounds = array<i64: 1, 1, 128>}, {transform_indices = @transform_3, window_bounds = array<i64: 1, 1, 128>}, {transform_indices = @transform_4, window_bounds = array<i64: 1, 1, 128>}]} {
    %c0_i32 = arith.constant 0 : i32
    %0 = arith.cmpi eq, %arg1, %c0_i32 : i32
    %1 = arith.extui %0 : i1 to i32
    %c0_i32_0 = arith.constant 0 : i32
    %2 = arith.cmpi ne, %1, %c0_i32_0 : i32
    scf.if %2 {
      %cst_29 = arith.constant 0.000000e+00 : f32
      %56 = vector.broadcast %cst_29 : f32 to vector<8x128xf32>
      %c0_30 = arith.constant 0 : index
      %c0_31 = arith.constant 0 : index
      %57 = vector.load %arg7[%c0_30, %c0_31] : memref<8x128xf32, #tpu.memory_space<vmem>>, vector<8x128xf32>
      tpu.vector_store %arg7[%c0_30, %c0_31], %56 {strides = array<i32>} : memref<8x128xf32, #tpu.memory_space<vmem>>, vector<8x128xf32>,
      %cst_32 = arith.constant 0.000000e+00 : f32
      %58 = vector.broadcast %cst_32 : f32 to vector<8x128xf32>
      %c0_33 = arith.constant 0 : index
      %c0_34 = arith.constant 0 : index
      %59 = vector.load %arg8[%c0_33, %c0_34] : memref<8x128xf32, #tpu.memory_space<vmem>>, vector<8x128xf32>
      tpu.vector_store %arg8[%c0_33, %c0_34], %58 {strides = array<i32>} : memref<8x128xf32, #tpu.memory_space<vmem>>, vector<8x128xf32>,
      %cst_35 = arith.constant 0.000000e+00 : f32
      %60 = vector.broadcast %cst_35 : f32 to vector<8x128xf32>
      %c0_36 = arith.constant 0 : index
      %c0_37 = arith.constant 0 : index
      %61 = vector.load %arg9[%c0_36, %c0_37] : memref<8x128xf32, #tpu.memory_space<vmem>>, vector<8x128xf32>
      tpu.vector_store %arg9[%c0_36, %c0_37], %60 {strides = array<i32>} : memref<8x128xf32, #tpu.memory_space<vmem>>, vector<8x128xf32>,
    } else {
    }
    %cst = arith.constant 0.000000e+00 : f32
    %3 = vector.broadcast %cst : f32 to vector<8x128xf32>
    %c0_i32_1 = arith.constant 0 : i32
    %c8_i32 = arith.constant 8 : i32
    %4 = arith.muli %c0_i32_1, %c8_i32 : i32
    %5 = tpu.assume_multiple %4, 8 : i32
    %c0 = arith.constant 0 : index
    %6 = arith.index_cast %5 : i32 to index
    %c0_2 = arith.constant 0 : index
    %7 = vector.load %arg2[%c0, %6, %c0_2] : memref<1x8x128xf32, #tpu.memory_space<vmem>>, vector<1x8x128xf32>
    %8 = vector.shape_cast %7 : vector<1x8x128xf32> to vector<8x128xf32>
    %c0_3 = arith.constant 0 : index
    %9 = arith.index_cast %5 : i32 to index
    %c0_4 = arith.constant 0 : index
    %10 = vector.load %arg3[%c0_3, %9, %c0_4] : memref<1x8x128xf32, #tpu.memory_space<vmem>>, vector<1x8x128xf32>
    %11 = vector.shape_cast %10 : vector<1x8x128xf32> to vector<8x128xf32>
    %cst_5 = arith.constant 5.000000e-01 : f32
    %12 = vector.broadcast %cst_5 : f32 to vector<8x128xf32>
    %13 = arith.mulf %12, %8 : vector<8x128xf32>
    %14 = math.tanh %13 : vector<8x128xf32>
    %cst_6 = arith.constant 5.000000e-01 : f32
    %15 = vector.broadcast %cst_6 : f32 to vector<8x128xf32>
    %16 = arith.mulf %15, %14 : vector<8x128xf32>
    %cst_7 = arith.constant 5.000000e-01 : f32
    %17 = vector.broadcast %cst_7 : f32 to vector<8x128xf32>
    %18 = arith.addf %16, %17 : vector<8x128xf32>
    %19 = arith.mulf %18, %18 : vector<8x128xf32>
    %cst_8 = arith.constant 2.500000e-01 : f32
    %20 = vector.broadcast %cst_8 : f32 to vector<8x128xf32>
    %21 = arith.mulf %20, %19 : vector<8x128xf32>
    %cst_9 = arith.constant -0.00674603181 : f32
    %22 = vector.broadcast %cst_9 : f32 to vector<8x128xf32>
    %23 = arith.mulf %21, %22 : vector<8x128xf32>
    %cst_10 = arith.constant 0.0222222228 : f32
    %24 = vector.broadcast %cst_10 : f32 to vector<8x128xf32>
    %25 = arith.addf %24, %23 : vector<8x128xf32>
    %26 = arith.mulf %21, %25 : vector<8x128xf32>
    %cst_11 = arith.constant -0.0833333358 : f32
    %27 = vector.broadcast %cst_11 : f32 to vector<8x128xf32>
    %28 = arith.addf %27, %26 : vector<8x128xf32>
    %29 = arith.mulf %21, %28 : vector<8x128xf32>
    %cst_12 = arith.constant 5.000000e-01 : f32
    %30 = vector.broadcast %cst_12 : f32 to vector<8x128xf32>
    %31 = arith.addf %30, %29 : vector<8x128xf32>
    %32 = arith.mulf %21, %31 : vector<8x128xf32>
    %cst_13 = arith.constant 5.000000e-01 : f32
    %33 = vector.broadcast %cst_13 : f32 to vector<8x128xf32>
    %34 = arith.subf %33, %11 : vector<8x128xf32>
    %35 = arith.mulf %18, %34 : vector<8x128xf32>
    %cst_14 = arith.constant 0.693147182 : f32
    %36 = vector.broadcast %cst_14 : f32 to vector<8x128xf32>
    %37 = arith.addf %36, %32 : vector<8x128xf32>
    %38 = arith.addf %35, %37 : vector<8x128xf32>
    %39 = arith.mulf %18, %11 : vector<8x128xf32>
    %40 = arith.addf %3, %39 : vector<8x128xf32>
    %41 = arith.addf %18, %11 : vector<8x128xf32>
    %42 = arith.addf %3, %41 : vector<8x128xf32>
    %43 = arith.addf %3, %38 : vector<8x128xf32>
    %c1_i32 = arith.constant 1 : i32
    %c0_15 = arith.constant 0 : index
    %c0_16 = arith.constant 0 : index
    %44 = vector.load %arg7[%c0_15, %c0_16] : memref<8x128xf32, #tpu.memory_space<vmem>>, vector<8x128xf32>
    %45 = arith.addf %44, %40 : vector<8x128xf32>
    %c0_17 = arith.constant 0 : index
    %c0_18 = arith.constant 0 : index
    %46 = vector.load %arg7[%c0_17, %c0_18] : memref<8x128xf32, #tpu.memory_space<vmem>>, vector<8x128xf32>
    tpu.vector_store %arg7[%c0_17, %c0_18], %45 {strides = array<i32>} : memref<8x128xf32, #tpu.memory_space<vmem>>, vector<8x128xf32>,
    %c0_19 = arith.constant 0 : index
    %c0_20 = arith.constant 0 : index
    %47 = vector.load %arg8[%c0_19, %c0_20] : memref<8x128xf32, #tpu.memory_space<vmem>>, vector<8x128xf32>
    %48 = arith.addf %47, %42 : vector<8x128xf32>
    %c0_21 = arith.constant 0 : index
    %c0_22 = arith.constant 0 : index
    %49 = vector.load %arg8[%c0_21, %c0_22] : memref<8x128xf32, #tpu.memory_space<vmem>>, vector<8x128xf32>
    tpu.vector_store %arg8[%c0_21, %c0_22], %48 {strides = array<i32>} : memref<8x128xf32, #tpu.memory_space<vmem>>, vector<8x128xf32>,
    %c0_23 = arith.constant 0 : index
    %c0_24 = arith.constant 0 : index
    %50 = vector.load %arg9[%c0_23, %c0_24] : memref<8x128xf32, #tpu.memory_space<vmem>>, vector<8x128xf32>
    %51 = arith.addf %50, %43 : vector<8x128xf32>
    %c0_25 = arith.constant 0 : index
    %c0_26 = arith.constant 0 : index
    %52 = vector.load %arg9[%c0_25, %c0_26] : memref<8x128xf32, #tpu.memory_space<vmem>>, vector<8x128xf32>
    tpu.vector_store %arg9[%c0_25, %c0_26], %51 {strides = array<i32>} : memref<8x128xf32, #tpu.memory_space<vmem>>, vector<8x128xf32>,
    %c0_i32_27 = arith.constant 0 : i32
    %53 = arith.cmpi eq, %arg1, %c0_i32_27 : i32
    %54 = arith.extui %53 : i1 to i32
    %c0_i32_28 = arith.constant 0 : i32
    %55 = arith.cmpi ne, %54, %c0_i32_28 : i32
    scf.if %55 {
      %c0_29 = arith.constant 0 : index
      %c0_30 = arith.constant 0 : index
      %56 = vector.load %arg7[%c0_29, %c0_30] : memref<8x128xf32, #tpu.memory_space<vmem>>, vector<8x128xf32>
      %cst_31 = arith.constant dense<0.000000e+00> : vector<128xf32>
      %57 = vector.multi_reduction <add>, %56, %cst_31 [0] : vector<8x128xf32> to vector<128xf32>
      %58 = vector.shape_cast %57 : vector<128xf32> to vector<1x128xf32>
      %c0_32 = arith.constant 0 : index
      %c0_33 = arith.constant 0 : index
      %c0_34 = arith.constant 0 : index
      %59 = vector.load %arg4[%c0_32, %c0_33, %c0_34] : memref<1x1x128xf32, #tpu.memory_space<vmem>>, vector<1x1x128xf32>
      %60 = vector.shape_cast %59 : vector<1x1x128xf32> to vector<1x128xf32>
      %61 = vector.shape_cast %58 : vector<1x128xf32> to vector<1x1x128xf32>
      tpu.vector_store %arg4[%c0_32, %c0_33, %c0_34], %61 {strides = array<i32>} : memref<1x1x128xf32, #tpu.memory_space<vmem>>, vector<1x1x128xf32>,
      %c0_35 = arith.constant 0 : index
      %c0_36 = arith.constant 0 : index
      %62 = vector.load %arg8[%c0_35, %c0_36] : memref<8x128xf32, #tpu.memory_space<vmem>>, vector<8x128xf32>
      %cst_37 = arith.constant dense<0.000000e+00> : vector<128xf32>
      %63 = vector.multi_reduction <add>, %62, %cst_37 [0] : vector<8x128xf32> to vector<128xf32>
      %64 = vector.shape_cast %63 : vector<128xf32> to vector<1x128xf32>
      %c0_38 = arith.constant 0 : index
      %c0_39 = arith.constant 0 : index
      %c0_40 = arith.constant 0 : index
      %65 = vector.load %arg5[%c0_38, %c0_39, %c0_40] : memref<1x1x128xf32, #tpu.memory_space<vmem>>, vector<1x1x128xf32>
      %66 = vector.shape_cast %65 : vector<1x1x128xf32> to vector<1x128xf32>
      %67 = vector.shape_cast %64 : vector<1x128xf32> to vector<1x1x128xf32>
      tpu.vector_store %arg5[%c0_38, %c0_39, %c0_40], %67 {strides = array<i32>} : memref<1x1x128xf32, #tpu.memory_space<vmem>>, vector<1x1x128xf32>,
      %c0_41 = arith.constant 0 : index
      %c0_42 = arith.constant 0 : index
      %68 = vector.load %arg9[%c0_41, %c0_42] : memref<8x128xf32, #tpu.memory_space<vmem>>, vector<8x128xf32>
      %cst_43 = arith.constant dense<0.000000e+00> : vector<128xf32>
      %69 = vector.multi_reduction <add>, %68, %cst_43 [0] : vector<8x128xf32> to vector<128xf32>
      %70 = vector.shape_cast %69 : vector<128xf32> to vector<1x128xf32>
      %c0_44 = arith.constant 0 : index
      %c0_45 = arith.constant 0 : index
      %c0_46 = arith.constant 0 : index
      %71 = vector.load %arg6[%c0_44, %c0_45, %c0_46] : memref<1x1x128xf32, #tpu.memory_space<vmem>>, vector<1x1x128xf32>
      %72 = vector.shape_cast %71 : vector<1x1x128xf32> to vector<1x128xf32>
      %73 = vector.shape_cast %70 : vector<1x128xf32> to vector<1x1x128xf32>
      tpu.vector_store %arg6[%c0_44, %c0_45, %c0_46], %73 {strides = array<i32>} : memref<1x1x128xf32, #tpu.memory_space<vmem>>, vector<1x1x128xf32>,
    } else {
    }
    return
  }
  func.func @transform_0(%arg0: i32, %arg1: i32) -> (i32, i32, i32) {
    %c0_i32 = arith.constant 0 : i32
    %c0_i32_0 = arith.constant 0 : i32
    return %arg0, %arg1, %c0_i32 : i32, i32, i32
  }
  func.func @transform_1(%arg0: i32, %arg1: i32) -> (i32, i32, i32) {
    %c0_i32 = arith.constant 0 : i32
    %c0_i32_0 = arith.constant 0 : i32
    return %arg0, %arg1, %c0_i32 : i32, i32, i32
  }
  func.func @transform_2(%arg0: i32, %arg1: i32) -> (i32, i32, i32) {
    %c0_i32 = arith.constant 0 : i32
    %c0_i32_0 = arith.constant 0 : i32
    %c0_i32_1 = arith.constant 0 : i32
    return %arg0, %c0_i32, %c0_i32_0 : i32, i32, i32
  }
  func.func @transform_3(%arg0: i32, %arg1: i32) -> (i32, i32, i32) {
    %c0_i32 = arith.constant 0 : i32
    %c0_i32_0 = arith.constant 0 : i32
    %c0_i32_1 = arith.constant 0 : i32
    return %arg0, %c0_i32, %c0_i32_0 : i32, i32, i32
  }
  func.func @transform_4(%arg0: i32, %arg1: i32) -> (i32, i32, i32) {
    %c0_i32 = arith.constant 0 : i32
    %c0_i32_0 = arith.constant 0 : i32
    %c0_i32_1 = arith.constant 0 : i32
    return %arg0, %c0_i32, %c0_i32_0 : i32, i32, i32
  }
}

</mosaic_0001>

<bundles_post_ra>
// kernel: dice_bce_loss.1
= control target key start
LH: loop header
LB: loop body
LE: loop exit
PB: predicated region body
PF: predicated region fallthrough
CT: control target
= control target key end

     0   :  { %s533_s15 = smov 0   ;;  %s535_s16 = smov 0   ;;  %s581_s0 = inlined_call_operand.vmem [shape: f32[2,8,128], index: 0, kind: input, shape index: {}]   ;;  %s582_s1 = inlined_call_operand.vmem [shape: f32[2,8,128], index: 1, kind: input, shape index: {}]   ;;  %s583_s2 = inlined_call_operand.vmem [shape: f32[2,1,128], index: 2, kind: output, shape index: {0}]   ;;  %s584_s3 = inlined_call_operand.vmem [shape: f32[2,1,128], index: 3, kind: output, shape index: {1}]   ;;  %s585_s4 = inlined_call_operand.vmem [shape: f32[2,1,128], index: 4, kind: output, shape index: {2}]  }
   0x1   :  { %s537_s17 = smov 0  }
   0x2 LB: > { %s27_s18 = sadd.s32 1, %s502_s16  ;;  %p453_p0 = scmp.ge.s32.totalorder %s506_s17, 1  ;;  %s506_s17 = sphi %s537_s17, %s15_s17   ;;  %s502_s16 = sphi %s535_s16, %s587_s16   ;;  %s498_s15 = sphi %s533_s15, %s586_s15  }
   0x3   : > { %p29_p1 = scmp.ge.s32.totalorder %s27_s18, 2  ;;  %p197_p2 = scmp.lt.s32.totalorder %s506_s17, 3 }
   0x5   : > { %s589_s18 = smov (%p29_p1, %s27_s18), 0  ;;  %p198_p3 = pnand %p453_p0, %p197_p2 }
   0x6   : > { %p236_p4 = scmp.lt.s32.totalorder (!%p198_p3), %s498_s15, 1 }
   0x7   : > { %201 = sbr.rel (%p198_p3) target bundleno = 64 (0x40), region = 28 }
   0xc   : > { %s591_s15 = smov (!%p236_p4, %s498_s15), 1 }
   0xd   : > { %s454_s19 = sshll.u32 %s591_s15, 3  ;;  %s252_s28 = scalar_lea.vmem %s583_s2, %s591_s15 }
   0xe   : > { %s242_s22 = scalar_lea.vmem %s581_s0, %s454_s19  ;;  %s249_s25 = scalar_lea.vmem %s582_s1, %s454_s19 }
   0xf   : > { %v266_v0 = vld [vmem:[%s242_s22] sm:$0xff]  ;;  %s255_s5 = scalar_lea.vmem %s584_s3, %s591_s15  ;;  %s258_s8 = scalar_lea.vmem %s585_s4, %s591_s15 }
  0x10   : > { %v268_v1 = vmul.f32 0.5, %v266_v0  ;;  %v267_v5 = vld [vmem:[%s249_s25] sm:$0xff] }
  0x11   : > { %v281_v27 = vsub.f32 0.5, %v267_v5 }
  0x12   : > { %482 = vtanh.f32 %v268_v1 }
  0x18   : > { %v483_v2 = vpop.eup %482 }
  0x19   : > { %v270_v3 = vmul.f32 0.5, %v483_v2 }
  0x1b   : > { %v271_v4 = vadd.f32 0.5, %v270_v3 }
  0x1d   : > { %v285_v6 = vmul.f32 %v271_v4, %v267_v5  ;;  %v287_v7 = vadd.f32 %v271_v4, %v267_v5  ;;  %v272_v8 = vmul.f32 %v271_v4, %v271_v4  ;;  %v282_v30 = vmul.f32 %v281_v27, %v271_v4 }
  0x1f   : > { %v303_v9 = vrot.slane %v285_v6, 4  ;;  %v311_v10 = vrot.slane %v287_v7, 4  ;;  %v273_v11 = vmul.f32 0.25, %v272_v8 }
  0x21   : > { %v304_v12 = vadd.f32 %v303_v9, %v285_v6  ;;  %v312_v13 = vadd.f32 %v311_v10, %v287_v7  ;;  %v274_v14 = vmul.f32 -0.006746032, %v273_v11 }
  0x23   : > { %v305_v15 = vrot.slane %v304_v12, 2  ;;  %v313_v16 = vrot.slane %v312_v13, 2  ;;  %v275_v17 = vadd.f32 0.022222223, %v274_v14 }
  0x25   : > { %v306_v18 = vadd.f32 %v305_v15, %v304_v12  ;;  %v314_v19 = vadd.f32 %v313_v16, %v312_v13  ;;  %v276_v20 = vmul.f32 %v275_v17, %v273_v11 }
  0x27   : > { %v307_v21 = vrot.slane %v306_v18, 1  ;;  %v315_v22 = vrot.slane %v314_v19, 1  ;;  %v277_v23 = vadd.f32 -0.083333336, %v276_v20 }
  0x29   : > { %v308_v24 = vadd.f32 %v307_v21, %v306_v18  ;;  %v316_v25 = vadd.f32 %v315_v22, %v314_v19  ;;  %v278_v26 = vmul.f32 %v277_v23, %v273_v11 }
  0x2b   : > { %309 = vst [vmem:[%s252_s28] sm:$0x1] %v308_v24  ;;  %v279_v28 = vadd.f32 0.5, %v278_v26 }
  0x2c   : > { %317 = vst [vmem:[%s255_s5] sm:$0x1] %v316_v25 }
  0x2d   : > { %v280_v29 = vmul.f32 %v279_v28, %v273_v11 }
  0x2f   : > { %v283_v31 = vadd.f32 0.6931472, %v280_v29 }
  0x31   : > { %v284_v32 = vadd.f32 %v283_v31, %v282_v30 }
  0x33   : > { %v319_v33 = vrot.slane %v284_v32, 4 }
  0x35   : > { %v320_v34 = vadd.f32 %v319_v33, %v284_v32 }
  0x37   : > { %v321_v35 = vrot.slane %v320_v34, 2 }
  0x39   : > { %v322_v36 = vadd.f32 %v321_v35, %v320_v34 }
  0x3b   : > { %v323_v37 = vrot.slane %v322_v36, 1 }
  0x3d   : > { %v324_v38 = vadd.f32 %v323_v37, %v322_v36 }
  0x3f   : > { %325 = vst [vmem:[%s258_s8] sm:$0x1] %v324_v38 }
  0x40 PF: > { %s15_s17 = sadd.s32 1, %s506_s17   ;;  %s586_s15 = smov %s502_s16 }
  0x41   : > { %p12_p5 = scmp.ge.s32.totalorder %s15_s17, 4   ;;  %s587_s16 = smov %s589_s18 }
  0x43   :  { %14 = sbr.rel (!%p12_p5) target bundleno = 2 (0x2), region = 93 }

</bundles_post_ra>
